<compile_context>
chip_gen: v5e
topology: v5e:2x2
jax: 0.10.0
libtpu: 0.0.40
codegen_flags: <defaults>
</compile_context>

<pallas_src>
import jax
import jax.numpy as jnp
from jax import lax
from jax.experimental import pallas as pl
from jax.experimental.pallas import tpu as pltpu

LANES = 128
SUBLANES = 8
ALIGN = LANES * SUBLANES             # 1024 elements = one (8, 128) f32 vreg
TILE_BYTES_PER_INPUT = 4 << 20       # per-input, per-pipeline-buffer tile budget


def _cdiv(a: int, b: int) -> int:
    return -(-a // b)


def _round_down(a: int, b: int) -> int:
    return (a // b) * b


def _num_tensorcores() -> int:
    """Best-effort TensorCore count; defaults to 1 (correct for v5e/v6e)."""
    try:
        info = pltpu.get_tpu_info()
    except Exception:
        return 1
    for attr in ("num_cores", "core_count", "num_tensorcores", "cores_per_chip"):
        v = getattr(info, attr, None)
        if isinstance(v, int) and 1 <= v <= 16:
            return v
    return 1


def mse_sum(output: jax.Array, target: jax.Array, *, max_tile_rows=None) -> jax.Array:
    """sum((output - target)^2), matching F.mse_loss(..., reduction='sum')."""
    assert output.shape == target.shape, "shapes must match (no broadcasting in mse_loss)"
    out_dtype = jnp.promote_types(output.dtype, target.dtype)

    n = int(output.size)
    if n == 0:
        return jnp.zeros((), out_dtype)

    flat_o = jnp.ravel(output)        # free for contiguous inputs
    flat_t = jnp.ravel(target)

    n_major = _round_down(n, ALIGN)   # kernel handles the 1024-aligned prefix

    # <1024-element ragged tail (and sub-vreg inputs): tiny plain-jnp reduce.
    tail = jnp.zeros((), jnp.float32)
    if n_major < n:
        dt = flat_o[n_major:].astype(jnp.float32) - flat_t[n_major:].astype(jnp.float32)
        tail = jnp.sum(dt * dt)
    if n_major == 0:
        return tail.astype(out_dtype)

    rows = n_major // LANES           # multiple of 8
    o2 = (flat_o if n_major == n else flat_o[:n_major]).reshape(rows, LANES)
    t2 = (flat_t if n_major == n else flat_t[:n_major]).reshape(rows, LANES)

    # --- tile sizing --------------------------------------------------------
    itemsize = max(o2.dtype.itemsize, t2.dtype.itemsize)
    budget_rows = max(SUBLANES,
                      _round_down(TILE_BYTES_PER_INPUT // (LANES * itemsize), SUBLANES))
    tile_rows = min(budget_rows, rows)          # both are multiples of 8
    if max_tile_rows is not None:               # test/tuning override
        tile_rows = min(tile_rows, max(SUBLANES, _round_down(max_tile_rows, SUBLANES)))

    total_blocks = _cdiv(rows, tile_rows)
    num_slices = max(1, min(_num_tensorcores(), total_blocks))
    blocks_per_slice = _cdiv(total_blocks, num_slices)

    partial_last = (rows % tile_rows) != 0
    has_duplicates = num_slices * blocks_per_slice != total_blocks
    needs_mask = partial_last or has_duplicates
    first_masked_blk = (total_blocks - 1) if partial_last else total_blocks

    # --- kernel -------------------------------------------------------------
    def kernel(o_ref, t_ref, out_ref, acc_ref):
        # o_ref, t_ref : (tile_rows, 128) VMEM tiles (native dtype)
        # out_ref      : (1, 1) SMEM per-slice partial sum
        # acc_ref      : (8, 128) f32 VMEM accumulator (persists across steps)
        i = pl.program_id(1)

        @pl.when(i == 0)
        def _():
            acc_ref[...] = jnp.zeros_like(acc_ref)

        def fold(mask_rows=None):
            d = o_ref[...].astype(jnp.float32) - t_ref[...].astype(jnp.float32)
            if mask_rows is not None:
                d = jnp.where(mask_rows, d, 0.0)
            sq = d * d
            # Tile-aligned fold into the (8,128) accumulator: pure VPU vreg adds.
            acc_ref[...] += jnp.sum(
                sq.reshape(tile_rows // SUBLANES, SUBLANES, LANES), axis=0)

        if not needs_mask:
            # Steady state: every block full and in range -> no mask emitted.
            fold()
        else:
            blk = pl.program_id(0) * blocks_per_slice + i

            @pl.when(blk < first_masked_blk)     # fast path: full in-range blocks
            def _():
                fold()

            @pl.when(blk >= first_masked_blk)    # partial last / duplicate blocks
            def _():
                row_ids = blk * tile_rows + lax.broadcasted_iota(
                    jnp.int32, (tile_rows, LANES), 0)
                fold(mask_rows=row_ids < rows)

        # Single cross-lane reduce + scalar write only in the epilogue.
        @pl.when(i == pl.num_programs(1) - 1)
        def _():
            out_ref[0, 0] = jnp.sum(acc_ref[...])

    # --- index maps ---------------------------------------------------------
    if has_duplicates:
        # Clamp so DMAs of excess (fully-masked) blocks stay inside the array.
        def in_map(p, i):
            return (jnp.minimum(p * blocks_per_slice + i, total_blocks - 1), 0)
    else:
        def in_map(p, i):
            return (p * blocks_per_slice + i, 0)

    in_tile_bytes = tile_rows * LANES * (o2.dtype.itemsize + t2.dtype.itemsize)
    vmem_limit = min(max(32 << 20, 2 * in_tile_bytes + (4 << 20)), 48 << 20)

    cost = pl.CostEstimate(
        flops=3 * n_major,
        transcendentals=0,
        bytes_accessed=n_major * (o2.dtype.itemsize + t2.dtype.itemsize) + 4 * num_slices,
    )

    # TODO(synk): verify axis-0 actually shards across TensorCores on v7x; if it
    # runs serially, switch axis 0 to pltpu.CORE_PARALLEL.
    partials = pl.pallas_call(
        kernel,
        out_shape=jax.ShapeDtypeStruct((num_slices, 1), jnp.float32),
        grid_spec=pltpu.PrefetchScalarGridSpec(
            num_scalar_prefetch=0,
            grid=(num_slices, blocks_per_slice),
            in_specs=[
                pl.BlockSpec((tile_rows, LANES), in_map),
                pl.BlockSpec((tile_rows, LANES), in_map),
            ],
            out_specs=pl.BlockSpec(
                (1, 1), lambda p, i: (p, 0), memory_space=pltpu.SMEM
            ),
            scratch_shapes=[pltpu.VMEM((SUBLANES, LANES), jnp.float32)],
        ),
        compiler_params=pltpu.CompilerParams(
            dimension_semantics=("parallel", "arbitrary"),
            vmem_limit_bytes=vmem_limit,
        ),
        cost_estimate=cost,
    )(o2, t2)

    return (jnp.sum(partials) + tail).astype(out_dtype)


if __name__ == "__main__":
    key = jax.random.PRNGKey(0)
    k1, k2, k3, k4, k5, k6, k7, k8 = jax.random.split(key, 8)

    # Primary NCHW image-like inputs (what the PyTorch module expects).
    x_shape = (2, 4, 16, 16)
    output = jax.random.normal(k1, x_shape, dtype=jnp.float32)
    target = jax.random.normal(k2, x_shape, dtype=jnp.float32)
    loss = mse_sum(output, target)
    jax.block_until_ready(loss)
    ref = jnp.sum((output - target) ** 2)
    assert jnp.allclose(loss, ref, rtol=1e-4, atol=1e-5), (loss, ref)

    # Multi-block + partial-last-block path (exercises the pl.when masked block
    # and, where a multi-core chip is detected, the slice axis / clamping).
    o_b = jax.random.normal(k3, (2, 3, 40, 128), dtype=jnp.float32)
    t_b = jax.random.normal(k4, (2, 3, 40, 128), dtype=jnp.float32)
    loss_b = mse_sum(o_b, t_b, max_tile_rows=64)
    jax.block_until_ready(loss_b)
    ref_b = jnp.sum((o_b - t_b) ** 2)
    assert jnp.allclose(loss_b, ref_b, rtol=1e-4, atol=1e-3), (loss_b, ref_b)

    # Ragged element count: kernel on the 1024-aligned prefix + tiny jnp tail.
    o_r = jax.random.normal(k5, (3, 7, 7, 7), dtype=jnp.float32)
    t_r = jax.random.normal(k6, (3, 7, 7, 7), dtype=jnp.float32)
    loss_r = mse_sum(o_r, t_r)
    jax.block_until_ready(loss_r)
    ref_r = jnp.sum((o_r - t_r) ** 2)
    assert jnp.allclose(loss_r, ref_r, rtol=1e-4, atol=1e-4), (loss_r, ref_r)

    # Tiny input (< one vreg): pure-jnp path.
    o_s = jax.random.normal(k7, (2, 3, 7, 5), dtype=jnp.float32)
    t_s = jax.random.normal(k8, (2, 3, 7, 5), dtype=jnp.float32)
    loss_s = mse_sum(o_s, t_s)
    jax.block_until_ready(loss_s)
    ref_s = jnp.sum((o_s - t_s) ** 2)
    assert jnp.allclose(loss_s, ref_s, rtol=1e-4, atol=1e-5), (loss_s, ref_s)

    print("KERNEL_OK")
</pallas_src>

<mosaic_0001>
module attributes {stable_mosaic.version = 11 : i64} {
  func.func @kernel(%arg0: i32, %arg1: i32, %arg2: memref<16x128xf32, #tpu.memory_space<vmem>>, %arg3: memref<16x128xf32, #tpu.memory_space<vmem>>, %arg4: memref<1x1xf32, #tpu.memory_space<smem>>, %arg5: memref<8x128xf32, #tpu.memory_space<vmem>>) attributes {dimension_semantics = [#tpu.dimension_semantics<parallel>, #tpu.dimension_semantics<arbitrary>], iteration_bounds = array<i64: 1, 1>, scalar_prefetch = 0 : i64, scratch_operands = 1 : i64, tpu.core_type = #tpu.core_type<tc>, window_params = [{transform_indices = @transform_0, window_bounds = array<i64: 16, 128>}, {transform_indices = @transform_1, window_bounds = array<i64: 16, 128>}, {transform_indices = @transform_2, window_bounds = array<i64: 1, 1>}]} {
    %c0_i32 = arith.constant 0 : i32
    %0 = arith.cmpi eq, %arg1, %c0_i32 : i32
    %1 = arith.extui %0 : i1 to i32
    %c0_i32_0 = arith.constant 0 : i32
    %2 = arith.cmpi ne, %1, %c0_i32_0 : i32
    scf.if %2 {
      %cst_10 = arith.constant 0.000000e+00 : f32
      %15 = vector.broadcast %cst_10 : f32 to vector<8x128xf32>
      %c0_11 = arith.constant 0 : index
      %c0_12 = arith.constant 0 : index
      %16 = vector.load %arg5[%c0_11, %c0_12] : memref<8x128xf32, #tpu.memory_space<vmem>>, vector<8x128xf32>
      tpu.vector_store %arg5[%c0_11, %c0_12], %15 {strides = array<i32>} : memref<8x128xf32, #tpu.memory_space<vmem>>, vector<8x128xf32>,
    } else {
    }
    %c0 = arith.constant 0 : index
    %c0_1 = arith.constant 0 : index
    %3 = vector.load %arg2[%c0, %c0_1] : memref<16x128xf32, #tpu.memory_space<vmem>>, vector<16x128xf32>
    %c0_2 = arith.constant 0 : index
    %c0_3 = arith.constant 0 : index
    %4 = vector.load %arg3[%c0_2, %c0_3] : memref<16x128xf32, #tpu.memory_space<vmem>>, vector<16x128xf32>
    %5 = arith.subf %3, %4 : vector<16x128xf32>
    %6 = arith.mulf %5, %5 : vector<16x128xf32>
    %c0_4 = arith.constant 0 : index
    %c0_5 = arith.constant 0 : index
    %7 = vector.load %arg5[%c0_4, %c0_5] : memref<8x128xf32, #tpu.memory_space<vmem>>, vector<8x128xf32>
    %8 = vector.shape_cast %6 : vector<16x128xf32> to vector<2x8x128xf32>
    %cst = arith.constant dense<0.000000e+00> : vector<8x128xf32>
    %9 = vector.multi_reduction <add>, %8, %cst [0] : vector<2x8x128xf32> to vector<8x128xf32>
    %10 = arith.addf %7, %9 : vector<8x128xf32>
    %c0_6 = arith.constant 0 : index
    %c0_7 = arith.constant 0 : index
    %11 = vector.load %arg5[%c0_6, %c0_7] : memref<8x128xf32, #tpu.memory_space<vmem>>, vector<8x128xf32>
    tpu.vector_store %arg5[%c0_6, %c0_7], %10 {strides = array<i32>} : memref<8x128xf32, #tpu.memory_space<vmem>>, vector<8x128xf32>,
    %c0_i32_8 = arith.constant 0 : i32
    %12 = arith.cmpi eq, %arg1, %c0_i32_8 : i32
    %13 = arith.extui %12 : i1 to i32
    %c0_i32_9 = arith.constant 0 : i32
    %14 = arith.cmpi ne, %13, %c0_i32_9 : i32
    scf.if %14 {
      %c0_10 = arith.constant 0 : index
      %c0_11 = arith.constant 0 : index
      %15 = vector.load %arg5[%c0_10, %c0_11] : memref<8x128xf32, #tpu.memory_space<vmem>>, vector<8x128xf32>
      %16 = vector.shape_cast %15 : vector<8x128xf32> to vector<1x8x128xf32>
      %cst_12 = arith.constant dense<0.000000e+00> : vector<1xf32>
      %17 = vector.multi_reduction <add>, %16, %cst_12 [1, 2] : vector<1x8x128xf32> to vector<1xf32>
      %18 = vector.shape_cast %17 : vector<1xf32> to vector<1x1x1xf32>
      %19 = vector.extract %18[0, 0, 0] : f32 from vector<1x1x1xf32>
      %c0_13 = arith.constant 0 : index
      %c0_14 = arith.constant 0 : index
      %20 = memref.load %arg4[%c0_13, %c0_14] : memref<1x1xf32, #tpu.memory_space<smem>>
      memref.store %19, %arg4[%c0_13, %c0_14] : memref<1x1xf32, #tpu.memory_space<smem>>
    } else {
    }
    return
  }
  func.func @transform_0(%arg0: i32, %arg1: i32) -> (i32, i32) {
    %c1_i32 = arith.constant 1 : i32
    %0 = arith.muli %arg0, %c1_i32 : i32
    %1 = arith.addi %0, %arg1 : i32
    %c0_i32 = arith.constant 0 : i32
    %c0_i32_0 = arith.constant 0 : i32
    return %1, %c0_i32 : i32, i32
  }
  func.func @transform_1(%arg0: i32, %arg1: i32) -> (i32, i32) {
    %c1_i32 = arith.constant 1 : i32
    %0 = arith.muli %arg0, %c1_i32 : i32
    %1 = arith.addi %0, %arg1 : i32
    %c0_i32 = arith.constant 0 : i32
    %c0_i32_0 = arith.constant 0 : i32
    return %1, %c0_i32 : i32, i32
  }
  func.func @transform_2(%arg0: i32, %arg1: i32) -> (i32, i32) {
    %c0_i32 = arith.constant 0 : i32
    %c0_i32_0 = arith.constant 0 : i32
    return %arg0, %c0_i32 : i32, i32
  }
}

</mosaic_0001>

<bundles_post_ra>
// kernel: tpu_custom_call.1
= control target key start
LH: loop header
LB: loop body
LE: loop exit
PB: predicated region body
PF: predicated region fallthrough
CT: control target
= control target key end

     0   :  { %7 = vsyncpa [#allocation4], 0  ;;  %s207_s0 = inlined_call_operand.hbm [shape: f32[16,128], index: 0, kind: input, shape index: {}]   ;;  %s208_s1 = inlined_call_operand.hbm [shape: f32[16,128], index: 1, kind: input, shape index: {}]   ;;  %s209_s2 = inlined_call_operand.hbm [shape: f32[1,1], index: 2, kind: output, shape index: {}]  }
   0x1   :  { %8 = vsyncpa [#allocation7], 0 }
   0x2   :  { %9 = vsyncpa [#allocation5], 0  ;;  %s18_s11 = sshll.u32 %s207_s0, 4  ;;  %s178_s12 = smov [#allocation3]   ;;  %s19_s11 = int_to_ptr.hbm [resolvable:$true] %s18_s11 }
   0x3   :  { %s20_s13 = sshll.u32 %s178_s12, 4  ;;  %s35_s16 = sshll.u32 %s208_s1, 4  ;;  %s21_s13 = int_to_ptr.vmem [resolvable:$true] %s20_s13  ;;  %s36_s16 = int_to_ptr.hbm [resolvable:$true] %s35_s16 }
   0x4   :  { %s179_s17 = smov 128   ;;  %s180_s18 = smov 8  }
   0x5   :  { %26 = dma.hbm_to_vmem [thread:$0]  %s19_s11, 256, %s21_s13, [#allocation4], %s179_s17, %s179_s17, %s180_s18  }
   0x6   :  { %s181_s19 = smov [#allocation6]  }
   0x7   :  { %s37_s20 = sshll.u32 %s181_s19, 4  ;;  %s38_s20 = int_to_ptr.vmem [resolvable:$true] %s37_s20 }
   0x8   :  { %43 = dma.hbm_to_vmem [thread:$0]  %s36_s16, 256, %s38_s20, [#allocation7], %s179_s17, %s179_s17, %s180_s18  }
   0x9   :  { %172 = dma.done.wait [#allocation4], 256  }
   0xa   :  { %173 = vsyncadd [#allocation4], 4294967040 }
   0xb   :  { %174 = dma.done.wait [#allocation7], 256  }
   0xc   :  { %175 = vsyncadd [#allocation7], 4294967040  ;;  %v61_v0 = vld [vmem:[#allocation3] sm:$0xff]  ;;  %v62_v1 = vld [vmem:[#allocation3 + $0x8] sm:$0xff]  ;;  %s93_s21 = sshll.u32 %s209_s2, 4  ;;  %s182_s23 = smov [#allocation8]   ;;  %s94_s21 = int_to_ptr.hbm [resolvable:$true] %s93_s21 }
   0xd   :  { %v63_v2 = vld [vmem:[#allocation6] sm:$0xff]  ;;  %v64_v3 = vld [vmem:[#allocation6 + $0x8] sm:$0xff] }
   0xe   :  { %v65_v4 = vsub.f32 %v61_v0, %v63_v2  ;;  %v66_v5 = vsub.f32 %v62_v1, %v64_v3 }
  0x10   :  { %v67_v6 = vmul.f32 %v65_v4, %v65_v4  ;;  %v68_v7 = vmul.f32 %v66_v5, %v66_v5 }
  0x12   :  { %v70_v8 = vadd.f32 %v68_v7, %v67_v6 }
  0x14   :  { %77 = vadd.xlane.f32.xlu0 %v70_v8 }
  0x87   :  { %v78_v9 = vpop.xlane.xlu0 %77 }
  0x88   :  { %v79_v10 = vrot.slane %v78_v9, 4 }
  0x8a   :  { %v80_v11 = vadd.f32 %v79_v10, %v78_v9 }
  0x8c   :  { %v81_v12 = vrot.slane %v80_v11, 2 }
  0x8e   :  { %v82_v13 = vadd.f32 %v81_v12, %v80_v11 }
  0x90   :  { %v83_v14 = vrot.slane %v82_v13, 1 }
  0x92   :  { %v84_v15 = vadd.f32 %v83_v14, %v82_v13 }
  0x94   :  { %105 = vpush %v84_v15 }
  0xc5   :  { %s106_s22 = spop %105 }
  0xc6   :  { %87 = sst [smem:[#allocation8]] %s106_s22 }
  0xc7   :  { %96 = dma.smem_to_hbm %s182_s23, 16, %s94_s21, [#allocation5]  }
  0xc8   :  { %176 = dma.done.wait [#allocation5], 16  }
  0xc9   :  { %177 = vsyncadd [#allocation5], 4294967280 }
  0xca   :  { %101 = sfence }
  0xcb   :  { %102 = vsyncpa [#allocation4], 1 }
  0xcc   :  { %103 = vsyncpa [#allocation7], 1 }
  0xcd   :  { %104 = vsyncpa [#allocation5], 1 }

</bundles_post_ra>
